<compile_context>
chip_gen: v6e
topology: v6e:2x2x1
jax: 0.10.0
libtpu: 0.0.40
codegen_flags: <defaults>
</compile_context>

<pallas_src>
import jax
import jax.numpy as jnp
from jax.experimental import pallas as pl
from jax.experimental.pallas import tpu as pltpu

SEQ = 8     # seq_len of the position-embedding table (small test shape)
DIM = 32    # embedding dimension


# ------------------------------ kernels --------------------------------------
def _gram_kernel_single(pe_ref, out_ref):
    """Whole problem in one VMEM block: (S, D) -> (S, S) = pe @ pe.T."""
    pe = pe_ref[...]                                  # native dtype -> MXU
    # einsum('ij,kj->ik'): contract the last dim of BOTH operands ("NT" matmul),
    # so no wrapper-side transpose is needed; accumulate in f32.
    scores = jax.lax.dot_general(
        pe, pe,
        dimension_numbers=(((1,), (1,)), ((), ())),
        preferred_element_type=jnp.float32,
    )
    out_ref[...] = scores.astype(out_ref.dtype)


def _gram_kernel_tiled(row_ref, col_ref, out_ref):
    """One (tm, tn) output tile: rows (tm, D) x cols (tn, D) -> (tm, tn)."""
    scores = jax.lax.dot_general(
        row_ref[...], col_ref[...],                   # native dtype -> MXU
        dimension_numbers=(((1,), (1,)), ((), ())),
        preferred_element_type=jnp.float32,
    )
    out_ref[...] = scores.astype(out_ref.dtype)


# ------------------------------ wrapper ---------------------------------------
def dot_product_relative_position_encoding(position_embeddings):
    """position_embeddings: (S, D) -> (S, S) relative position scores."""
    S, D = position_embeddings.shape
    dtype = position_embeddings.dtype
    itemsize = jnp.dtype(dtype).itemsize

    cost = pl.CostEstimate(
        flops=2 * S * S * D,
        transcendentals=0,
        bytes_accessed=(S * D + S * S) * itemsize,
    )

    # Tiny problem (like the S=8 test shape): one grid step, one VMEM block per
    # operand.  Lane-dense tiling / megacore sharding only pay off once S is a
    # multiple of 128 and large enough to amortize per-step overhead.
    use_tiled = (S % 128 == 0) and (S >= 256)

    if not use_tiled:
        return pl.pallas_call(
            _gram_kernel_single,
            out_shape=jax.ShapeDtypeStruct((S, S), dtype),
            in_specs=[pl.BlockSpec((S, D), lambda: (0, 0))],
            out_specs=pl.BlockSpec((S, S), lambda: (0, 0)),
            cost_estimate=cost,
        )(position_embeddings)

    # Large-S path: lane-dense output tiles (last dim a multiple of 128),
    # both output axes "parallel" (v7x 2-TC sharding; no-op on v5e/v6e).
    tm = 256 if S % 256 == 0 else 128
    tn = 512 if S % 512 == 0 else (256 if S % 256 == 0 else 128)
    grid = (S // tm, S // tn)

    return pl.pallas_call(
        _gram_kernel_tiled,
        out_shape=jax.ShapeDtypeStruct((S, S), dtype),
        grid_spec=pltpu.PrefetchScalarGridSpec(
            num_scalar_prefetch=0,
            grid=grid,
            in_specs=[
                pl.BlockSpec((tm, D), lambda i, j: (i, 0)),   # row block
                pl.BlockSpec((tn, D), lambda i, j: (j, 0)),   # col block
            ],
            out_specs=pl.BlockSpec((tm, tn), lambda i, j: (i, j)),
        ),
        compiler_params=pltpu.CompilerParams(
            dimension_semantics=("parallel", "parallel"),
            # Sized against v7x's 64 MiB physical VMEM (32 MiB default scoped).
            vmem_limit_bytes=48 * 1024 * 1024,
        ),
        cost_estimate=cost,
    )(position_embeddings, position_embeddings)


# ---------------- pure-JAX reference (for sanity check) -----------------------
def reference(position_embeddings):
    return jnp.einsum("ij,kj->ik", position_embeddings, position_embeddings)


if __name__ == "__main__":
    key = jax.random.PRNGKey(0)

    # Primary check at the module's small test shape (single-block path).
    pe = jax.random.normal(key, (SEQ, DIM), jnp.float32)
    out = jax.block_until_ready(dot_product_relative_position_encoding(pe))
    ref = reference(pe)
    assert out.shape == (SEQ, SEQ)
    assert jnp.allclose(out, ref, atol=1e-4, rtol=1e-4), "mismatch (small path)"

    # Secondary check exercising the lane-dense tiled path (still quick).
    pe_big = jax.random.normal(key, (256, DIM), jnp.float32)
    out_big = jax.block_until_ready(dot_product_relative_position_encoding(pe_big))
    ref_big = reference(pe_big)
    assert out_big.shape == (256, 256)
    assert jnp.allclose(out_big, ref_big, atol=1e-3, rtol=1e-3), "mismatch (tiled path)"

    print("KERNEL_OK")
</pallas_src>

<mosaic_0001>
module attributes {stable_mosaic.version = 11 : i64} {
  func.func @_gram_kernel_single(%arg0: memref<8x32xf32, #tpu.memory_space<vmem>>, %arg1: memref<8x8xf32, #tpu.memory_space<vmem>>) attributes {dimension_semantics = [], scalar_prefetch = 0 : i64, scratch_operands = 0 : i64, tpu.core_type = #tpu.core_type<tc>} {
    %c0 = arith.constant 0 : index
    %c0_0 = arith.constant 0 : index
    %0 = vector.load %arg0[%c0, %c0_0] : memref<8x32xf32, #tpu.memory_space<vmem>>, vector<8x32xf32>
    %cst = arith.constant dense<0.000000e+00> : vector<8x8xf32>
    %1 = tpu.matmul %0, %0, %cst {dimension_numbers = #tpu.dot_dimension_numbers<[1], [1], [0], [0], [0, 0, 1, 0], [], []>} : vector<8x32xf32>, vector<8x32xf32>, vector<8x8xf32> -> vector<8x8xf32>
    %c0_1 = arith.constant 0 : index
    %c0_2 = arith.constant 0 : index
    %2 = vector.load %arg1[%c0_1, %c0_2] : memref<8x8xf32, #tpu.memory_space<vmem>>, vector<8x8xf32>
    tpu.vector_store %arg1[%c0_1, %c0_2], %1 {strides = array<i32>} : memref<8x8xf32, #tpu.memory_space<vmem>>, vector<8x8xf32>,
    return
  }
}

</mosaic_0001>

<bundles_post_ra>
// kernel: tpu_custom_call.1
= control target key start
LH: loop header
LB: loop body
LE: loop exit
PB: predicated region body
PF: predicated region fallthrough
CT: control target
= control target key end

     0   :  { %6 = vsyncpa [#allocation3], 0  ;;  %s190_s0 = inlined_call_operand.hbm [shape: f32[8,32], index: 0, kind: input, shape index: {}]   ;;  %s191_s1 = inlined_call_operand.hbm [shape: f32[8,8], index: 1, kind: output, shape index: {}]  }
   0x1   :  { %7 = vsyncpa [#allocation4], 0  ;;  %s170_s6 = smov [#allocation2]  }
   0x2   :  { %s14_s7 = sshll.u32 %s170_s6, 4  ;;  %s15_s7 = int_to_ptr.vmem [resolvable:$true] %s14_s7 }
   0x3   :  { %s134_s8 = scalar_lea.vmem %s15_s7, 128  ;;  %p139_p1 = scmp.lt.s32.totalorder %s15_s7, %s15_s7 }
   0x4   :  { %p135_p0 = scmp.ne.s32.totalorder %s15_s7, %s134_s8  ;;  %p140_p2 = scmp.lt.s32.totalorder %s134_s8, %s134_s8 }
   0x6   :  { %p141_p3 = por %p140_p2, %p139_p1 }
   0x8   :  { %p142_p4 = pnand %p141_p3, %p135_p0 }
   0xa   :  { %145 = shalt.err (!%p142_p4)
}
   0xb   :  { %17 = dma.hbm_to_vmem [thread:$0]  %s190_s0, 128, %s15_s7, [#allocation3]  }
   0xc   :  { %166 = dma.done.wait [#allocation3], 128  }
   0xd   :  { %167 = vsyncadd [#allocation3], 4294967168  ;;  %v171_v0 = vmov 0.0   ;;  %vm172_vm0 = vmmov 0   ;;  %vm22_vm1 = vcmask 261120   ;;  %v21_v1 = vld [vmem:[#allocation2] sm:$0xff] }
   0xe   :  { %117 = vmatprep.subr.mxu0 %v171_v0  ;;  %119 = vmatprep.mubr.msk.f32.mxu0 %vm172_vm0, %v171_v0  ;;  %s173_s11 = smov [#allocation5]   ;;  %vm96_vm2 = vcmask 64512  }
   0xf   :  { %118 = vmatpush3.xpose.msk.msra.mxu0 %vm22_vm1, %v21_v1  ;;  %s104_s12 = sshll.u32 %s173_s11, 4  ;;  %s105_s12 = int_to_ptr.vmem [resolvable:$true] %s104_s12 }
  0x10   :  { %s146_s13 = scalar_lea.vmem %s105_s12, 128  ;;  %p151_p6 = scmp.lt.s32.totalorder %s105_s12, %s105_s12 }
  0x11   :  { %p147_p5 = scmp.ne.s32.totalorder %s105_s12, %s146_s13  ;;  %p152_p7 = scmp.lt.s32.totalorder %s146_s13, %s146_s13 }
  0x12   :  { %120 = vmatmul.mubr.msk.f32.vlgmr.msra.gmra.mxu0 %vm22_vm1, %v21_v1 }
  0x13   :  { %p153_p8 = por %p152_p7, %p151_p6 }
  0x15   :  { %p154_p9 = pnand %p153_p8, %p147_p5 }
  0xd2   :  { %v92_v2 = vpop.f32.mrf.mxu0 }
  0xd3   :  { %97 = vst.msk [vmem:[#allocation5] sm:$0xff] %vm96_vm2, %v92_v2 }
  0xd4   :  { %v121_v3 = vpop.f32.mrf.mxu0 }
  0xd5   :  { %157 = shalt.err (!%p154_p9)
}
  0xd6   :  { %107 = dma.vmem_to_hbm [thread:$0]  %s105_s12, 128, %s191_s1, [#allocation4]  }
  0xd7   :  { %168 = dma.done.wait [#allocation4], 128  }
  0xd8   :  { %169 = vsyncadd [#allocation4], 4294967168 }
  0xd9   :  { %111 = vsyncpa [#allocation3], 1 }
  0xda   :  { %112 = vsyncpa [#allocation4], 1 }

</bundles_post_ra>
